<compile_context>
chip_gen: v7x
topology: tpu7x:2x2x1
jax: 0.10.0
libtpu: 0.0.40
codegen_flags: <defaults>
</compile_context>

<pallas_src>
import functools

import jax
import jax.numpy as jnp
from jax.experimental import pallas as pl
from jax.experimental.pallas import tpu as pltpu


def _lstm_chunk_kernel(x_ref, wih_ref, whh_ref, b_ref, h0_ref, c0_ref,
                       y_ref, cn_ref, h_scr, c_scr,
                       *, hidden_size, time_chunk, matmul_dtype):
    """One (batch_tile, time_chunk) grid step of a fused single-layer LSTM.

    x_ref  : (TC, TB, E)   time-major input chunk (already in matmul_dtype)
    wih_ref: (E, 4H)       W_ih^T   (matmul_dtype)
    whh_ref: (H, 4H)       W_hh^T   (matmul_dtype)
    b_ref  : (1, 4H)       b_ih + b_hh (f32)
    h0/c0  : (TB, H)       initial state (consumed on the first time chunk only)
    y_ref  : (TB, TC*H)    lane-dense output slab for this chunk
    cn_ref : (TB, H)       final cell state (resident across time chunks)
    h_scr/c_scr : (TB, H)  f32 carries across time chunks
    """
    H = hidden_size
    TC = time_chunk

    @pl.when(pl.program_id(1) == 0)
    def _():
        h_scr[...] = h0_ref[...].astype(jnp.float32)
        c_scr[...] = c0_ref[...].astype(jnp.float32)

    h = h_scr[...]                                   # (TB, H) f32
    c = c_scr[...]
    wih = wih_ref[...]                               # (E, 4H)
    whh = whh_ref[...]                               # (H, 4H)
    TB = h.shape[0]

    # Loop-invariant: lane mask selecting the g (cell-candidate) gate quarter,
    # and the broadcast bias (hoisted: JAX doesn't CSE broadcast_in_dim).
    lane = jax.lax.broadcasted_iota(jnp.int32, (TB, 4 * H), 1)
    is_g = jnp.logical_and(lane >= 2 * H, lane < 3 * H)
    bias = jnp.broadcast_to(b_ref[...], (TB, 4 * H))

    # Static unroll: fine for TC <= ~16 (toy config uses TC = T = 8).
    # TODO(synk): for larger TC switch to lax.fori_loop(..., unroll=4..8) with
    # pl.ds(pl.multiple_of(...)) indexing to bound live ranges / code size.
    for s in range(TC):
        # Input projection: off the serial chain (depends only on x / W_ih).
        gx = jnp.dot(x_ref[s], wih, preferred_element_type=jnp.float32)
        # Recurrent projection: the only matmul on the per-step serial chain.
        gh = jnp.dot(h.astype(matmul_dtype), whh,
                     preferred_element_type=jnp.float32)
        gates = gx + gh + bias                       # (TB, 4H) f32

        # sigmoid(x) == 0.5 * (tanh(x/2) + 1): two tanh EUP pushes instead of
        # exp + reciprocal + tanh; extra scale/add co-issues on the VALU.
        sig = 0.5 * (jnp.tanh(0.5 * gates) + 1.0)
        tnh = jnp.tanh(gates)
        act = jnp.where(is_g, tnh, sig)              # i|f|g|o in PyTorch order

        i_g = act[:, 0 * H:1 * H]
        f_g = act[:, 1 * H:2 * H]
        g_g = act[:, 2 * H:3 * H]
        o_g = act[:, 3 * H:4 * H]
        c = f_g * c + i_g * g_g
        h = o_g * jnp.tanh(c)

        # Per-step VMEM store into the resident output block: O(1) vreg
        # pressure; the HBM writeback remains one dense (TB, TC*H) DMA/chunk.
        y_ref[:, s * H:(s + 1) * H] = h.astype(y_ref.dtype)

    h_scr[...] = h
    c_scr[...] = c
    cn_ref[...] = c.astype(cn_ref.dtype)


def _pick_time_chunk(T, B, E, H, in_itemsize, *, max_unroll=16,
                     vmem_budget_bytes=16 << 20):
    """Largest time chunk whose double-buffered streamed blocks fit the budget.

    Keeps TC*H a multiple of 128 lanes (or TC == T) so output blocks stay
    lane-aligned.  Budget is conservative (v7x scoped VMEM default is 32 MiB);
    pass vmem_limit_bytes when raising it on v5e/v6e (128 MiB physical VMEM).
    """
    cands = [tc for tc in range(1, min(T, max_unroll) + 1)
             if T % tc == 0 and (tc == T or (tc * H) % 128 == 0)]
    if not cands:
        return T
    fitting = [tc for tc in cands
               if 2 * (tc * B * E * in_itemsize + B * tc * H * 4)
               <= vmem_budget_bytes]
    return max(fitting) if fitting else min(cands)


def encoder_dropout_rnn_forward(x_btE, hidden, params, *, dropout_p=0.0,
                                time_chunk=None, batch_tile=None,
                                matmul_dtype=jnp.bfloat16,
                                vmem_limit_bytes=None):
    """Forward pass matching EncoderDropoutRNN.forward (LSTM, 1 layer, unidir).

    x_btE  : (B, T, E)  batch_first input
    hidden : (h0, c0), each (nlayers, B, H)
    returns (output (B, T, H), (h_n, c_n) each (nlayers, B, H))
    """
    del dropout_p  # p == 0.0 / eval mode -> nn.Dropout is the identity.
    # TODO(synk): training-mode dropout (p > 0) would need pltpu.prng_* masking.
    w_ih, w_hh, b_ih, b_hh = params
    h0_all, c0_all = hidden

    B, T, E = x_btE.shape
    H = w_hh.shape[1]
    out_dtype = x_btE.dtype

    TB = B if batch_tile is None else batch_tile
    assert B % TB == 0 and (TB == B or TB % 8 == 0)
    nb = B // TB

    TC = (_pick_time_chunk(T, TB, E, H, jnp.dtype(matmul_dtype).itemsize)
          if time_chunk is None else time_chunk)
    assert T % TC == 0
    n_chunks = T // TC

    # Stream x time-major in matmul_dtype (halves O(T) HBM traffic when bf16);
    # weights go transposed + matmul_dtype; f32 accumulation stays in-kernel.
    x_tbe = jnp.transpose(x_btE, (1, 0, 2)).astype(matmul_dtype)   # (T, B, E)
    wih_T = jnp.transpose(w_ih).astype(matmul_dtype)               # (E, 4H)
    whh_T = jnp.transpose(w_hh).astype(matmul_dtype)               # (H, 4H)
    bias = (b_ih + b_hh).astype(jnp.float32).reshape(1, 4 * H)     # (1, 4H)
    h0 = h0_all[0]                                                 # (B, H)
    c0 = c0_all[0]

    kernel = functools.partial(_lstm_chunk_kernel, hidden_size=H,
                               time_chunk=TC, matmul_dtype=matmul_dtype)

    cp = dict(dimension_semantics=("parallel", "arbitrary"))
    if vmem_limit_bytes is not None:
        cp["vmem_limit_bytes"] = vmem_limit_bytes

    y2d, c_n = pl.pallas_call(
        kernel,
        out_shape=(
            jax.ShapeDtypeStruct((B, T * H), out_dtype),   # lane-dense y slab
            jax.ShapeDtypeStruct((B, H), out_dtype),       # c_n
        ),
        grid_spec=pltpu.PrefetchScalarGridSpec(
            num_scalar_prefetch=0,
            grid=(nb, n_chunks),
            in_specs=[
                pl.BlockSpec((TC, TB, E), lambda i, j: (j, i, 0)),   # x chunk
                pl.BlockSpec((E, 4 * H), lambda i, j: (0, 0)),       # W_ih^T
                pl.BlockSpec((H, 4 * H), lambda i, j: (0, 0)),       # W_hh^T
                pl.BlockSpec((1, 4 * H), lambda i, j: (0, 0)),       # bias
                pl.BlockSpec((TB, H), lambda i, j: (i, 0)),          # h0
                pl.BlockSpec((TB, H), lambda i, j: (i, 0)),          # c0
            ],
            out_specs=[
                pl.BlockSpec((TB, TC * H), lambda i, j: (i, j)),     # y chunk
                pl.BlockSpec((TB, H), lambda i, j: (i, 0)),          # c_n
            ],
            scratch_shapes=[
                pltpu.VMEM((TB, H), jnp.float32),                    # h carry
                pltpu.VMEM((TB, H), jnp.float32),                    # c carry
            ],
        ),
        compiler_params=pltpu.CompilerParams(**cp),
    )(x_tbe, wih_T, whh_T, bias, h0, c0)

    output = y2d.reshape(B, T, H)          # batch_first, free row-major reshape
    h_n = output[:, -1, :]                 # last hidden state == h_n (1 layer)
    return output, (h_n[None, :, :], c_n[None, :, :])


def _reference_lstm(x_btE, hidden, params):
    """Pure-JAX reference implementing PyTorch's single-layer LSTM."""
    w_ih, w_hh, b_ih, b_hh = params
    h0_all, c0_all = hidden
    H = w_hh.shape[1]
    h, c = h0_all[0], c0_all[0]
    x_tbE = jnp.transpose(x_btE, (1, 0, 2))

    def step(carry, x_t):
        h, c = carry
        gates = x_t @ w_ih.T + b_ih + h @ w_hh.T + b_hh
        i = jax.nn.sigmoid(gates[:, 0 * H:1 * H])
        f = jax.nn.sigmoid(gates[:, 1 * H:2 * H])
        g = jnp.tanh(gates[:, 2 * H:3 * H])
        o = jax.nn.sigmoid(gates[:, 3 * H:4 * H])
        c_new = f * c + i * g
        h_new = o * jnp.tanh(c_new)
        return (h_new, c_new), h_new

    (h_n, c_n), ys = jax.lax.scan(step, (h, c), x_tbE)
    return jnp.transpose(ys, (1, 0, 2)), (h_n[None], c_n[None])


if __name__ == "__main__":
    # Config: nlayers=1, emsize=32, nhid=32, dropout=0.0, model='LSTM',
    #         bidirection=False, cell=False
    B, T, E, H, NLAYERS = 8, 8, 32, 32, 1

    key = jax.random.PRNGKey(0)
    k_x, k1, k2, k3, k4, k5, k6 = jax.random.split(key, 7)
    bound = 1.0 / jnp.sqrt(H)

    x = jax.random.normal(k_x, (B, T, E), dtype=jnp.float32)
    w_ih = jax.random.uniform(k1, (4 * H, E), jnp.float32, -bound, bound)
    w_hh = jax.random.uniform(k2, (4 * H, H), jnp.float32, -bound, bound)
    b_ih = jax.random.uniform(k3, (4 * H,), jnp.float32, -bound, bound)
    b_hh = jax.random.uniform(k4, (4 * H,), jnp.float32, -bound, bound)
    params = (w_ih, w_hh, b_ih, b_hh)

    # init_weights(bsz) equivalent for LSTM: zero (h0, c0).
    h0 = jnp.zeros((NLAYERS, B, H), jnp.float32)
    c0 = jnp.zeros((NLAYERS, B, H), jnp.float32)
    ref_out, (ref_h, ref_c) = _reference_lstm(x, (h0, c0), params)

    # 1) f32 matmuls, whole sequence as one chunk: tight agreement.
    out, (h_n, c_n) = encoder_dropout_rnn_forward(
        x, (h0, c0), params, matmul_dtype=jnp.float32)
    jax.block_until_ready((out, h_n, c_n))
    assert out.shape == (B, T, H) and h_n.shape == (NLAYERS, B, H)
    assert jnp.allclose(out, ref_out, atol=1e-4, rtol=1e-4)
    assert jnp.allclose(h_n, ref_h, atol=1e-4, rtol=1e-4)
    assert jnp.allclose(c_n, ref_c, atol=1e-4, rtol=1e-4)

    # 2) f32, multiple time chunks + nonzero initial state: exercises the
    #    cross-chunk h/c carry and chunked lane-dense writeback.
    h0r = jax.random.normal(k5, (NLAYERS, B, H), jnp.float32) * 0.1
    c0r = jax.random.normal(k6, (NLAYERS, B, H), jnp.float32) * 0.1
    ref_out2, (ref_h2, ref_c2) = _reference_lstm(x, (h0r, c0r), params)
    out2, (h_n2, c_n2) = encoder_dropout_rnn_forward(
        x, (h0r, c0r), params, matmul_dtype=jnp.float32, time_chunk=4)
    jax.block_until_ready((out2, h_n2, c_n2))
    assert jnp.allclose(out2, ref_out2, atol=1e-4, rtol=1e-4)
    assert jnp.allclose(h_n2, ref_h2, atol=1e-4, rtol=1e-4)
    assert jnp.allclose(c_n2, ref_c2, atol=1e-4, rtol=1e-4)

    # 3) Default perf path: bf16-operand matmuls, f32 accumulation/carries.
    out3, (h_n3, c_n3) = encoder_dropout_rnn_forward(x, (h0, c0), params)
    jax.block_until_ready((out3, h_n3, c_n3))
    assert jnp.allclose(out3, ref_out, atol=5e-2, rtol=5e-2)
    assert jnp.allclose(h_n3, ref_h, atol=5e-2, rtol=5e-2)
    assert jnp.allclose(c_n3, ref_c, atol=5e-2, rtol=5e-2)

    print("KERNEL_OK")
</pallas_src>

<mosaic_0001>
module attributes {stable_mosaic.version = 11 : i64} {
  func.func @_lstm_chunk_kernel(%arg0: i32, %arg1: i32, %arg2: memref<8x8x32xf32, #tpu.memory_space<vmem>>, %arg3: memref<32x128xf32, #tpu.memory_space<vmem>>, %arg4: memref<32x128xf32, #tpu.memory_space<vmem>>, %arg5: memref<1x128xf32, #tpu.memory_space<vmem>>, %arg6: memref<8x32xf32, #tpu.memory_space<vmem>>, %arg7: memref<8x32xf32, #tpu.memory_space<vmem>>, %arg8: memref<8x256xf32, #tpu.memory_space<vmem>>, %arg9: memref<8x32xf32, #tpu.memory_space<vmem>>, %arg10: memref<8x32xf32, #tpu.memory_space<vmem>>, %arg11: memref<8x32xf32, #tpu.memory_space<vmem>>) attributes {dimension_semantics = [#tpu.dimension_semantics<parallel>, #tpu.dimension_semantics<arbitrary>], iteration_bounds = array<i64: 1, 1>, scalar_prefetch = 0 : i64, scratch_operands = 2 : i64, tpu.core_type = #tpu.core_type<tc>, window_params = [{transform_indices = @transform_0, window_bounds = array<i64: 8, 8, 32>}, {pipeline_mode = #tpu.pipeline_mode<synchronous>, transform_indices = @transform_1, window_bounds = array<i64: 32, 128>}, {pipeline_mode = #tpu.pipeline_mode<synchronous>, transform_indices = @transform_2, window_bounds = array<i64: 32, 128>}, {pipeline_mode = #tpu.pipeline_mode<synchronous>, transform_indices = @transform_3, window_bounds = array<i64: 1, 128>}, {transform_indices = @transform_4, window_bounds = array<i64: 8, 32>}, {transform_indices = @transform_5, window_bounds = array<i64: 8, 32>}, {transform_indices = @transform_6, window_bounds = array<i64: 8, 256>}, {transform_indices = @transform_7, window_bounds = array<i64: 8, 32>}]} {
    %c0_i32 = arith.constant 0 : i32
    %0 = arith.cmpi eq, %arg1, %c0_i32 : i32
    %1 = arith.extui %0 : i1 to i32
    %c0_i32_0 = arith.constant 0 : i32
    %2 = arith.cmpi ne, %1, %c0_i32_0 : i32
    scf.if %2 {
      %c0_81 = arith.constant 0 : index
      %c0_82 = arith.constant 0 : index
      %219 = vector.load %arg6[%c0_81, %c0_82] : memref<8x32xf32, #tpu.memory_space<vmem>>, vector<8x32xf32>
      %c0_83 = arith.constant 0 : index
      %c0_84 = arith.constant 0 : index
      %220 = vector.load %arg10[%c0_83, %c0_84] : memref<8x32xf32, #tpu.memory_space<vmem>>, vector<8x32xf32>
      tpu.vector_store %arg10[%c0_83, %c0_84], %219 {strides = array<i32>} : memref<8x32xf32, #tpu.memory_space<vmem>>, vector<8x32xf32>,
      %c0_85 = arith.constant 0 : index
      %c0_86 = arith.constant 0 : index
      %221 = vector.load %arg7[%c0_85, %c0_86] : memref<8x32xf32, #tpu.memory_space<vmem>>, vector<8x32xf32>
      %c0_87 = arith.constant 0 : index
      %c0_88 = arith.constant 0 : index
      %222 = vector.load %arg11[%c0_87, %c0_88] : memref<8x32xf32, #tpu.memory_space<vmem>>, vector<8x32xf32>
      tpu.vector_store %arg11[%c0_87, %c0_88], %221 {strides = array<i32>} : memref<8x32xf32, #tpu.memory_space<vmem>>, vector<8x32xf32>,
    } else {
    }
    %c0 = arith.constant 0 : index
    %c0_1 = arith.constant 0 : index
    %3 = vector.load %arg10[%c0, %c0_1] : memref<8x32xf32, #tpu.memory_space<vmem>>, vector<8x32xf32>
    %c0_2 = arith.constant 0 : index
    %c0_3 = arith.constant 0 : index
    %4 = vector.load %arg11[%c0_2, %c0_3] : memref<8x32xf32, #tpu.memory_space<vmem>>, vector<8x32xf32>
    %c0_4 = arith.constant 0 : index
    %c0_5 = arith.constant 0 : index
    %5 = vector.load %arg3[%c0_4, %c0_5] : memref<32x128xf32, #tpu.memory_space<vmem>>, vector<32x128xf32>
    %c0_6 = arith.constant 0 : index
    %c0_7 = arith.constant 0 : index
    %6 = vector.load %arg4[%c0_6, %c0_7] : memref<32x128xf32, #tpu.memory_space<vmem>>, vector<32x128xf32>
    %7 = tpu.iota {dimensions = array<i32: 1>} : vector<8x128xi32>
    %c64_i32 = arith.constant 64 : i32
    %8 = vector.broadcast %c64_i32 : i32 to vector<8x128xi32>
    %9 = arith.cmpi sge, %7, %8 : vector<8x128xi32>
    %c96_i32 = arith.constant 96 : i32
    %10 = vector.broadcast %c96_i32 : i32 to vector<8x128xi32>
    %11 = arith.cmpi slt, %7, %10 : vector<8x128xi32>
    %12 = arith.andi %9, %11 : vector<8x128xi1>
    %c0_8 = arith.constant 0 : index
    %c0_9 = arith.constant 0 : index
    %13 = vector.load %arg5[%c0_8, %c0_9] : memref<1x128xf32, #tpu.memory_space<vmem>>, vector<1x128xf32>
    %14 = vector.shape_cast %13 : vector<1x128xf32> to vector<1x128xf32>
    %15 = vector.broadcast %14 : vector<1x128xf32> to vector<8x128xf32>
    %c0_10 = arith.constant 0 : index
    %c0_11 = arith.constant 0 : index
    %c0_12 = arith.constant 0 : index
    %16 = vector.load %arg2[%c0_10, %c0_11, %c0_12] : memref<8x8x32xf32, #tpu.memory_space<vmem>>, vector<1x8x32xf32>
    %17 = vector.shape_cast %16 : vector<1x8x32xf32> to vector<8x32xf32>
    %cst = arith.constant dense<0.000000e+00> : vector<8x128xf32>
    %18 = tpu.matmul %17, %5, %cst {dimension_numbers = #tpu.dot_dimension_numbers<[1], [0], [0], [1], [0, 0, 1, 1], [], []>} : vector<8x32xf32>, vector<32x128xf32>, vector<8x128xf32> -> vector<8x128xf32>
    %cst_13 = arith.constant dense<0.000000e+00> : vector<8x128xf32>
    %19 = tpu.matmul %3, %6, %cst_13 {dimension_numbers = #tpu.dot_dimension_numbers<[1], [0], [0], [1], [0, 0, 1, 1], [], []>} : vector<8x32xf32>, vector<32x128xf32>, vector<8x128xf32> -> vector<8x128xf32>
    %20 = arith.addf %18, %19 : vector<8x128xf32>
    %21 = arith.addf %20, %15 : vector<8x128xf32>
    %cst_14 = arith.constant 5.000000e-01 : f32
    %22 = vector.broadcast %cst_14 : f32 to vector<8x128xf32>
    %23 = arith.mulf %22, %21 : vector<8x128xf32>
    %24 = math.tanh %23 : vector<8x128xf32>
    %cst_15 = arith.constant 1.000000e+00 : f32
    %25 = vector.broadcast %cst_15 : f32 to vector<8x128xf32>
    %26 = arith.addf %24, %25 : vector<8x128xf32>
    %cst_16 = arith.constant 5.000000e-01 : f32
    %27 = vector.broadcast %cst_16 : f32 to vector<8x128xf32>
    %28 = arith.mulf %27, %26 : vector<8x128xf32>
    %29 = math.tanh %21 : vector<8x128xf32>
    %30 = arith.select %12, %29, %28 : vector<8x128xi1>, vector<8x128xf32>
    %31 = vector.extract_strided_slice %30 {offsets = [0, 0], sizes = [8, 32], strides = [1, 1]} : vector<8x128xf32> to vector<8x32xf32>
    %32 = vector.extract_strided_slice %30 {offsets = [0, 32], sizes = [8, 32], strides = [1, 1]} : vector<8x128xf32> to vector<8x32xf32>
    %33 = vector.extract_strided_slice %30 {offsets = [0, 64], sizes = [8, 32], strides = [1, 1]} : vector<8x128xf32> to vector<8x32xf32>
    %34 = vector.extract_strided_slice %30 {offsets = [0, 96], sizes = [8, 32], strides = [1, 1]} : vector<8x128xf32> to vector<8x32xf32>
    %35 = arith.mulf %32, %4 : vector<8x32xf32>
    %36 = arith.mulf %31, %33 : vector<8x32xf32>
    %37 = arith.addf %35, %36 : vector<8x32xf32>
    %38 = math.tanh %37 : vector<8x32xf32>
    %39 = arith.mulf %34, %38 : vector<8x32xf32>
    %c0_17 = arith.constant 0 : index
    %c0_18 = arith.constant 0 : index
    %40 = vector.load %arg8[%c0_17, %c0_18] : memref<8x256xf32, #tpu.memory_space<vmem>>, vector<8x32xf32>
    tpu.vector_store %arg8[%c0_17, %c0_18], %39 {strides = array<i32>} : memref<8x256xf32, #tpu.memory_space<vmem>>, vector<8x32xf32>,
    %c1 = arith.constant 1 : index
    %c0_19 = arith.constant 0 : index
    %c0_20 = arith.constant 0 : index
    %41 = vector.load %arg2[%c1, %c0_19, %c0_20] : memref<8x8x32xf32, #tpu.memory_space<vmem>>, vector<1x8x32xf32>
    %42 = vector.shape_cast %41 : vector<1x8x32xf32> to vector<8x32xf32>
    %cst_21 = arith.constant dense<0.000000e+00> : vector<8x128xf32>
    %43 = tpu.matmul %42, %5, %cst_21 {dimension_numbers = #tpu.dot_dimension_numbers<[1], [0], [0], [1], [0, 0, 1, 1], [], []>} : vector<8x32xf32>, vector<32x128xf32>, vector<8x128xf32> -> vector<8x128xf32>
    %cst_22 = arith.constant dense<0.000000e+00> : vector<8x128xf32>
    %44 = tpu.matmul %39, %6, %cst_22 {dimension_numbers = #tpu.dot_dimension_numbers<[1], [0], [0], [1], [0, 0, 1, 1], [], []>} : vector<8x32xf32>, vector<32x128xf32>, vector<8x128xf32> -> vector<8x128xf32>
    %45 = arith.addf %43, %44 : vector<8x128xf32>
    %46 = arith.addf %45, %15 : vector<8x128xf32>
    %cst_23 = arith.constant 5.000000e-01 : f32
    %47 = vector.broadcast %cst_23 : f32 to vector<8x128xf32>
    %48 = arith.mulf %47, %46 : vector<8x128xf32>
    %49 = math.tanh %48 : vector<8x128xf32>
    %cst_24 = arith.constant 1.000000e+00 : f32
    %50 = vector.broadcast %cst_24 : f32 to vector<8x128xf32>
    %51 = arith.addf %49, %50 : vector<8x128xf32>
    %cst_25 = arith.constant 5.000000e-01 : f32
    %52 = vector.broadcast %cst_25 : f32 to vector<8x128xf32>
    %53 = arith.mulf %52, %51 : vector<8x128xf32>
    %54 = math.tanh %46 : vector<8x128xf32>
    %55 = arith.select %12, %54, %53 : vector<8x128xi1>, vector<8x128xf32>
    %56 = vector.extract_strided_slice %55 {offsets = [0, 0], sizes = [8, 32], strides = [1, 1]} : vector<8x128xf32> to vector<8x32xf32>
    %57 = vector.extract_strided_slice %55 {offsets = [0, 32], sizes = [8, 32], strides = [1, 1]} : vector<8x128xf32> to vector<8x32xf32>
    %58 = vector.extract_strided_slice %55 {offsets = [0, 64], sizes = [8, 32], strides = [1, 1]} : vector<8x128xf32> to vector<8x32xf32>
    %59 = vector.extract_strided_slice %55 {offsets = [0, 96], sizes = [8, 32], strides = [1, 1]} : vector<8x128xf32> to vector<8x32xf32>
    %60 = arith.mulf %57, %37 : vector<8x32xf32>
    %61 = arith.mulf %56, %58 : vector<8x32xf32>
    %62 = arith.addf %60, %61 : vector<8x32xf32>
    %63 = math.tanh %62 : vector<8x32xf32>
    %64 = arith.mulf %59, %63 : vector<8x32xf32>
    %c0_26 = arith.constant 0 : index
    %c32 = arith.constant 32 : index
    %65 = vector.load %arg8[%c0_26, %c32] : memref<8x256xf32, #tpu.memory_space<vmem>>, vector<8x32xf32>
    tpu.vector_store %arg8[%c0_26, %c32], %64 {strides = array<i32>} : memref<8x256xf32, #tpu.memory_space<vmem>>, vector<8x32xf32>,
    %c2 = arith.constant 2 : index
    %c0_27 = arith.constant 0 : index
    %c0_28 = arith.constant 0 : index
    %66 = vector.load %arg2[%c2, %c0_27, %c0_28] : memref<8x8x32xf32, #tpu.memory_space<vmem>>, vector<1x8x32xf32>
    %67 = vector.shape_cast %66 : vector<1x8x32xf32> to vector<8x32xf32>
    %cst_29 = arith.constant dense<0.000000e+00> : vector<8x128xf32>
    %68 = tpu.matmul %67, %5, %cst_29 {dimension_numbers = #tpu.dot_dimension_numbers<[1], [0], [0], [1], [0, 0, 1, 1], [], []>} : vector<8x32xf32>, vector<32x128xf32>, vector<8x128xf32> -> vector<8x128xf32>
    %cst_30 = arith.constant dense<0.000000e+00> : vector<8x128xf32>
    %69 = tpu.matmul %64, %6, %cst_30 {dimension_numbers = #tpu.dot_dimension_numbers<[1], [0], [0], [1], [0, 0, 1, 1], [], []>} : vector<8x32xf32>, vector<32x128xf32>, vector<8x128xf32> -> vector<8x128xf32>
    %70 = arith.addf %68, %69 : vector<8x128xf32>
    %71 = arith.addf %70, %15 : vector<8x128xf32>
    %cst_31 = arith.constant 5.000000e-01 : f32
    %72 = vector.broadcast %cst_31 : f32 to vector<8x128xf32>
    %73 = arith.mulf %72, %71 : vector<8x128xf32>
    %74 = math.tanh %73 : vector<8x128xf32>
    %cst_32 = arith.constant 1.000000e+00 : f32
    %75 = vector.broadcast %cst_32 : f32 to vector<8x128xf32>
    %76 = arith.addf %74, %75 : vector<8x128xf32>
    %cst_33 = arith.constant 5.000000e-01 : f32
    %77 = vector.broadcast %cst_33 : f32 to vector<8x128xf32>
    %78 = arith.mulf %77, %76 : vector<8x128xf32>
    %79 = math.tanh %71 : vector<8x128xf32>
    %80 = arith.select %12, %79, %78 : vector<8x128xi1>, vector<8x128xf32>
    %81 = vector.extract_strided_slice %80 {offsets = [0, 0], sizes = [8, 32], strides = [1, 1]} : vector<8x128xf32> to vector<8x32xf32>
    %82 = vector.extract_strided_slice %80 {offsets = [0, 32], sizes = [8, 32], strides = [1, 1]} : vector<8x128xf32> to vector<8x32xf32>
    %83 = vector.extract_strided_slice %80 {offsets = [0, 64], sizes = [8, 32], strides = [1, 1]} : vector<8x128xf32> to vector<8x32xf32>
    %84 = vector.extract_strided_slice %80 {offsets = [0, 96], sizes = [8, 32], strides = [1, 1]} : vector<8x128xf32> to vector<8x32xf32>
    %85 = arith.mulf %82, %62 : vector<8x32xf32>
    %86 = arith.mulf %81, %83 : vector<8x32xf32>
    %87 = arith.addf %85, %86 : vector<8x32xf32>
    %88 = math.tanh %87 : vector<8x32xf32>
    %89 = arith.mulf %84, %88 : vector<8x32xf32>
    %c0_34 = arith.constant 0 : index
    %c64 = arith.constant 64 : index
    %90 = vector.load %arg8[%c0_34, %c64] : memref<8x256xf32, #tpu.memory_space<vmem>>, vector<8x32xf32>
    tpu.vector_store %arg8[%c0_34, %c64], %89 {strides = array<i32>} : memref<8x256xf32, #tpu.memory_space<vmem>>, vector<8x32xf32>,
    %c3 = arith.constant 3 : index
    %c0_35 = arith.constant 0 : index
    %c0_36 = arith.constant 0 : index
    %91 = vector.load %arg2[%c3, %c0_35, %c0_36] : memref<8x8x32xf32, #tpu.memory_space<vmem>>, vector<1x8x32xf32>
    %92 = vector.shape_cast %91 : vector<1x8x32xf32> to vector<8x32xf32>
    %cst_37 = arith.constant dense<0.000000e+00> : vector<8x128xf32>
    %93 = tpu.matmul %92, %5, %cst_37 {dimension_numbers = #tpu.dot_dimension_numbers<[1], [0], [0], [1], [0, 0, 1, 1], [], []>} : vector<8x32xf32>, vector<32x128xf32>, vector<8x128xf32> -> vector<8x128xf32>
    %cst_38 = arith.constant dense<0.000000e+00> : vector<8x128xf32>
    %94 = tpu.matmul %89, %6, %cst_38 {dimension_numbers = #tpu.dot_dimension_numbers<[1], [0], [0], [1], [0, 0, 1, 1], [], []>} : vector<8x32xf32>, vector<32x128xf32>, vector<8x128xf32> -> vector<8x128xf32>
    %95 = arith.addf %93, %94 : vector<8x128xf32>
    %96 = arith.addf %95, %15 : vector<8x128xf32>
    %cst_39 = arith.constant 5.000000e-01 : f32
    %97 = vector.broadcast %cst_39 : f32 to vector<8x128xf32>
    %98 = arith.mulf %97, %96 : vector<8x128xf32>
    %99 = math.tanh %98 : vector<8x128xf32>
    %cst_40 = arith.constant 1.000000e+00 : f32
    %100 = vector.broadcast %cst_40 : f32 to vector<8x128xf32>
    %101 = arith.addf %99, %100 : vector<8x128xf32>
    %cst_41 = arith.constant 5.000000e-01 : f32
    %102 = vector.broadcast %cst_41 : f32 to vector<8x128xf32>
    %103 = arith.mulf %102, %101 : vector<8x128xf32>
    %104 = math.tanh %96 : vector<8x128xf32>
    %105 = arith.select %12, %104, %103 : vector<8x128xi1>, vector<8x128xf32>
    %106 = vector.extract_strided_slice %105 {offsets = [0, 0], sizes = [8, 32], strides = [1, 1]} : vector<8x128xf32> to vector<8x32xf32>
    %107 = vector.extract_strided_slice %105 {offsets = [0, 32], sizes = [8, 32], strides = [1, 1]} : vector<8x128xf32> to vector<8x32xf32>
    %108 = vector.extract_strided_slice %105 {offsets = [0, 64], sizes = [8, 32], strides = [1, 1]} : vector<8x128xf32> to vector<8x32xf32>
    %109 = vector.extract_strided_slice %105 {offsets = [0, 96], sizes = [8, 32], strides = [1, 1]} : vector<8x128xf32> to vector<8x32xf32>
    %110 = arith.mulf %107, %87 : vector<8x32xf32>
    %111 = arith.mulf %106, %108 : vector<8x32xf32>
    %112 = arith.addf %110, %111 : vector<8x32xf32>
    %113 = math.tanh %112 : vector<8x32xf32>
    %114 = arith.mulf %109, %113 : vector<8x32xf32>
    %c0_42 = arith.constant 0 : index
    %c96 = arith.constant 96 : index
    %115 = vector.load %arg8[%c0_42, %c96] : memref<8x256xf32, #tpu.memory_space<vmem>>, vector<8x32xf32>
    tpu.vector_store %arg8[%c0_42, %c96], %114 {strides = array<i32>} : memref<8x256xf32, #tpu.memory_space<vmem>>, vector<8x32xf32>,
    %c4 = arith.constant 4 : index
    %c0_43 = arith.constant 0 : index
    %c0_44 = arith.constant 0 : index
    %116 = vector.load %arg2[%c4, %c0_43, %c0_44] : memref<8x8x32xf32, #tpu.memory_space<vmem>>, vector<1x8x32xf32>
    %117 = vector.shape_cast %116 : vector<1x8x32xf32> to vector<8x32xf32>
    %cst_45 = arith.constant dense<0.000000e+00> : vector<8x128xf32>
    %118 = tpu.matmul %117, %5, %cst_45 {dimension_numbers = #tpu.dot_dimension_numbers<[1], [0], [0], [1], [0, 0, 1, 1], [], []>} : vector<8x32xf32>, vector<32x128xf32>, vector<8x128xf32> -> vector<8x128xf32>
    %cst_46 = arith.constant dense<0.000000e+00> : vector<8x128xf32>
    %119 = tpu.matmul %114, %6, %cst_46 {dimension_numbers = #tpu.dot_dimension_numbers<[1], [0], [0], [1], [0, 0, 1, 1], [], []>} : vector<8x32xf32>, vector<32x128xf32>, vector<8x128xf32> -> vector<8x128xf32>
    %120 = arith.addf %118, %119 : vector<8x128xf32>
    %121 = arith.addf %120, %15 : vector<8x128xf32>
    %cst_47 = arith.constant 5.000000e-01 : f32
    %122 = vector.broadcast %cst_47 : f32 to vector<8x128xf32>
    %123 = arith.mulf %122, %121 : vector<8x128xf32>
    %124 = math.tanh %123 : vector<8x128xf32>
    %cst_48 = arith.constant 1.000000e+00 : f32
    %125 = vector.broadcast %cst_48 : f32 to vector<8x128xf32>
    %126 = arith.addf %124, %125 : vector<8x128xf32>
    %cst_49 = arith.constant 5.000000e-01 : f32
    %127 = vector.broadcast %cst_49 : f32 to vector<8x128xf32>
    %128 = arith.mulf %127, %126 : vector<8x128xf32>
    %129 = math.tanh %121 : vector<8x128xf32>
    %130 = arith.select %12, %129, %128 : vector<8x128xi1>, vector<8x128xf32>
    %131 = vector.extract_strided_slice %130 {offsets = [0, 0], sizes = [8, 32], strides = [1, 1]} : vector<8x128xf32> to vector<8x32xf32>
    %132 = vector.extract_strided_slice %130 {offsets = [0, 32], sizes = [8, 32], strides = [1, 1]} : vector<8x128xf32> to vector<8x32xf32>
    %133 = vector.extract_strided_slice %130 {offsets = [0, 64], sizes = [8, 32], strides = [1, 1]} : vector<8x128xf32> to vector<8x32xf32>
    %134 = vector.extract_strided_slice %130 {offsets = [0, 96], sizes = [8, 32], strides = [1, 1]} : vector<8x128xf32> to vector<8x32xf32>
    %135 = arith.mulf %132, %112 : vector<8x32xf32>
    %136 = arith.mulf %131, %133 : vector<8x32xf32>
    %137 = arith.addf %135, %136 : vector<8x32xf32>
    %138 = math.tanh %137 : vector<8x32xf32>
    %139 = arith.mulf %134, %138 : vector<8x32xf32>
    %c0_50 = arith.constant 0 : index
    %c128 = arith.constant 128 : index
    %140 = vector.load %arg8[%c0_50, %c128] : memref<8x256xf32, #tpu.memory_space<vmem>>, vector<8x32xf32>
    tpu.vector_store %arg8[%c0_50, %c128], %139 {strides = array<i32>} : memref<8x256xf32, #tpu.memory_space<vmem>>, vector<8x32xf32>,
    %c5 = arith.constant 5 : index
    %c0_51 = arith.constant 0 : index
    %c0_52 = arith.constant 0 : index
    %141 = vector.load %arg2[%c5, %c0_51, %c0_52] : memref<8x8x32xf32, #tpu.memory_space<vmem>>, vector<1x8x32xf32>
    %142 = vector.shape_cast %141 : vector<1x8x32xf32> to vector<8x32xf32>
    %cst_53 = arith.constant dense<0.000000e+00> : vector<8x128xf32>
    %143 = tpu.matmul %142, %5, %cst_53 {dimension_numbers = #tpu.dot_dimension_numbers<[1], [0], [0], [1], [0, 0, 1, 1], [], []>} : vector<8x32xf32>, vector<32x128xf32>, vector<8x128xf32> -> vector<8x128xf32>
    %cst_54 = arith.constant dense<0.000000e+00> : vector<8x128xf32>
    %144 = tpu.matmul %139, %6, %cst_54 {dimension_numbers = #tpu.dot_dimension_numbers<[1], [0], [0], [1], [0, 0, 1, 1], [], []>} : vector<8x32xf32>, vector<32x128xf32>, vector<8x128xf32> -> vector<8x128xf32>
    %145 = arith.addf %143, %144 : vector<8x128xf32>
    %146 = arith.addf %145, %15 : vector<8x128xf32>
    %cst_55 = arith.constant 5.000000e-01 : f32
    %147 = vector.broadcast %cst_55 : f32 to vector<8x128xf32>
    %148 = arith.mulf %147, %146 : vector<8x128xf32>
    %149 = math.tanh %148 : vector<8x128xf32>
    %cst_56 = arith.constant 1.000000e+00 : f32
    %150 = vector.broadcast %cst_56 : f32 to vector<8x128xf32>
    %151 = arith.addf %149, %150 : vector<8x128xf32>
    %cst_57 = arith.constant 5.000000e-01 : f32
    %152 = vector.broadcast %cst_57 : f32 to vector<8x128xf32>
    %153 = arith.mulf %152, %151 : vector<8x128xf32>
    %154 = math.tanh %146 : vector<8x128xf32>
    %155 = arith.select %12, %154, %153 : vector<8x128xi1>, vector<8x128xf32>
    %156 = vector.extract_strided_slice %155 {offsets = [0, 0], sizes = [8, 32], strides = [1, 1]} : vector<8x128xf32> to vector<8x32xf32>
    %157 = vector.extract_strided_slice %155 {offsets = [0, 32], sizes = [8, 32], strides = [1, 1]} : vector<8x128xf32> to vector<8x32xf32>
    %158 = vector.extract_strided_slice %155 {offsets = [0, 64], sizes = [8, 32], strides = [1, 1]} : vector<8x128xf32> to vector<8x32xf32>
    %159 = vector.extract_strided_slice %155 {offsets = [0, 96], sizes = [8, 32], strides = [1, 1]} : vector<8x128xf32> to vector<8x32xf32>
    %160 = arith.mulf %157, %137 : vector<8x32xf32>
    %161 = arith.mulf %156, %158 : vector<8x32xf32>
    %162 = arith.addf %160, %161 : vector<8x32xf32>
    %163 = math.tanh %162 : vector<8x32xf32>
    %164 = arith.mulf %159, %163 : vector<8x32xf32>
    %c0_58 = arith.constant 0 : index
    %c160 = arith.constant 160 : index
    %165 = vector.load %arg8[%c0_58, %c160] : memref<8x256xf32, #tpu.memory_space<vmem>>, vector<8x32xf32>
    tpu.vector_store %arg8[%c0_58, %c160], %164 {strides = array<i32>} : memref<8x256xf32, #tpu.memory_space<vmem>>, vector<8x32xf32>,
    %c6 = arith.constant 6 : index
    %c0_59 = arith.constant 0 : index
    %c0_60 = arith.constant 0 : index
    %166 = vector.load %arg2[%c6, %c0_59, %c0_60] : memref<8x8x32xf32, #tpu.memory_space<vmem>>, vector<1x8x32xf32>
    %167 = vector.shape_cast %166 : vector<1x8x32xf32> to vector<8x32xf32>
    %cst_61 = arith.constant dense<0.000000e+00> : vector<8x128xf32>
    %168 = tpu.matmul %167, %5, %cst_61 {dimension_numbers = #tpu.dot_dimension_numbers<[1], [0], [0], [1], [0, 0, 1, 1], [], []>} : vector<8x32xf32>, vector<32x128xf32>, vector<8x128xf32> -> vector<8x128xf32>
    %cst_62 = arith.constant dense<0.000000e+00> : vector<8x128xf32>
    %169 = tpu.matmul %164, %6, %cst_62 {dimension_numbers = #tpu.dot_dimension_numbers<[1], [0], [0], [1], [0, 0, 1, 1], [], []>} : vector<8x32xf32>, vector<32x128xf32>, vector<8x128xf32> -> vector<8x128xf32>
    %170 = arith.addf %168, %169 : vector<8x128xf32>
    %171 = arith.addf %170, %15 : vector<8x128xf32>
    %cst_63 = arith.constant 5.000000e-01 : f32
    %172 = vector.broadcast %cst_63 : f32 to vector<8x128xf32>
    %173 = arith.mulf %172, %171 : vector<8x128xf32>
    %174 = math.tanh %173 : vector<8x128xf32>
    %cst_64 = arith.constant 1.000000e+00 : f32
    %175 = vector.broadcast %cst_64 : f32 to vector<8x128xf32>
    %176 = arith.addf %174, %175 : vector<8x128xf32>
    %cst_65 = arith.constant 5.000000e-01 : f32
    %177 = vector.broadcast %cst_65 : f32 to vector<8x128xf32>
    %178 = arith.mulf %177, %176 : vector<8x128xf32>
    %179 = math.tanh %171 : vector<8x128xf32>
    %180 = arith.select %12, %179, %178 : vector<8x128xi1>, vector<8x128xf32>
    %181 = vector.extract_strided_slice %180 {offsets = [0, 0], sizes = [8, 32], strides = [1, 1]} : vector<8x128xf32> to vector<8x32xf32>
    %182 = vector.extract_strided_slice %180 {offsets = [0, 32], sizes = [8, 32], strides = [1, 1]} : vector<8x128xf32> to vector<8x32xf32>
    %183 = vector.extract_strided_slice %180 {offsets = [0, 64], sizes = [8, 32], strides = [1, 1]} : vector<8x128xf32> to vector<8x32xf32>
    %184 = vector.extract_strided_slice %180 {offsets = [0, 96], sizes = [8, 32], strides = [1, 1]} : vector<8x128xf32> to vector<8x32xf32>
    %185 = arith.mulf %182, %162 : vector<8x32xf32>
    %186 = arith.mulf %181, %183 : vector<8x32xf32>
    %187 = arith.addf %185, %186 : vector<8x32xf32>
    %188 = math.tanh %187 : vector<8x32xf32>
    %189 = arith.mulf %184, %188 : vector<8x32xf32>
    %c0_66 = arith.constant 0 : index
    %c192 = arith.constant 192 : index
    %190 = vector.load %arg8[%c0_66, %c192] : memref<8x256xf32, #tpu.memory_space<vmem>>, vector<8x32xf32>
    tpu.vector_store %arg8[%c0_66, %c192], %189 {strides = array<i32>} : memref<8x256xf32, #tpu.memory_space<vmem>>, vector<8x32xf32>,
    %c7 = arith.constant 7 : index
    %c0_67 = arith.constant 0 : index
    %c0_68 = arith.constant 0 : index
    %191 = vector.load %arg2[%c7, %c0_67, %c0_68] : memref<8x8x32xf32, #tpu.memory_space<vmem>>, vector<1x8x32xf32>
    %192 = vector.shape_cast %191 : vector<1x8x32xf32> to vector<8x32xf32>
    %cst_69 = arith.constant dense<0.000000e+00> : vector<8x128xf32>
    %193 = tpu.matmul %192, %5, %cst_69 {dimension_numbers = #tpu.dot_dimension_numbers<[1], [0], [0], [1], [0, 0, 1, 1], [], []>} : vector<8x32xf32>, vector<32x128xf32>, vector<8x128xf32> -> vector<8x128xf32>
    %cst_70 = arith.constant dense<0.000000e+00> : vector<8x128xf32>
    %194 = tpu.matmul %189, %6, %cst_70 {dimension_numbers = #tpu.dot_dimension_numbers<[1], [0], [0], [1], [0, 0, 1, 1], [], []>} : vector<8x32xf32>, vector<32x128xf32>, vector<8x128xf32> -> vector<8x128xf32>
    %195 = arith.addf %193, %194 : vector<8x128xf32>
    %196 = arith.addf %195, %15 : vector<8x128xf32>
    %cst_71 = arith.constant 5.000000e-01 : f32
    %197 = vector.broadcast %cst_71 : f32 to vector<8x128xf32>
    %198 = arith.mulf %197, %196 : vector<8x128xf32>
    %199 = math.tanh %198 : vector<8x128xf32>
    %cst_72 = arith.constant 1.000000e+00 : f32
    %200 = vector.broadcast %cst_72 : f32 to vector<8x128xf32>
    %201 = arith.addf %199, %200 : vector<8x128xf32>
    %cst_73 = arith.constant 5.000000e-01 : f32
    %202 = vector.broadcast %cst_73 : f32 to vector<8x128xf32>
    %203 = arith.mulf %202, %201 : vector<8x128xf32>
    %204 = math.tanh %196 : vector<8x128xf32>
    %205 = arith.select %12, %204, %203 : vector<8x128xi1>, vector<8x128xf32>
    %206 = vector.extract_strided_slice %205 {offsets = [0, 0], sizes = [8, 32], strides = [1, 1]} : vector<8x128xf32> to vector<8x32xf32>
    %207 = vector.extract_strided_slice %205 {offsets = [0, 32], sizes = [8, 32], strides = [1, 1]} : vector<8x128xf32> to vector<8x32xf32>
    %208 = vector.extract_strided_slice %205 {offsets = [0, 64], sizes = [8, 32], strides = [1, 1]} : vector<8x128xf32> to vector<8x32xf32>
    %209 = vector.extract_strided_slice %205 {offsets = [0, 96], sizes = [8, 32], strides = [1, 1]} : vector<8x128xf32> to vector<8x32xf32>
    %210 = arith.mulf %207, %187 : vector<8x32xf32>
    %211 = arith.mulf %206, %208 : vector<8x32xf32>
    %212 = arith.addf %210, %211 : vector<8x32xf32>
    %213 = math.tanh %212 : vector<8x32xf32>
    %214 = arith.mulf %209, %213 : vector<8x32xf32>
    %c0_74 = arith.constant 0 : index
    %c224 = arith.constant 224 : index
    %215 = vector.load %arg8[%c0_74, %c224] : memref<8x256xf32, #tpu.memory_space<vmem>>, vector<8x32xf32>
    tpu.vector_store %arg8[%c0_74, %c224], %214 {strides = array<i32>} : memref<8x256xf32, #tpu.memory_space<vmem>>, vector<8x32xf32>,
    %c0_75 = arith.constant 0 : index
    %c0_76 = arith.constant 0 : index
    %216 = vector.load %arg10[%c0_75, %c0_76] : memref<8x32xf32, #tpu.memory_space<vmem>>, vector<8x32xf32>
    tpu.vector_store %arg10[%c0_75, %c0_76], %214 {strides = array<i32>} : memref<8x32xf32, #tpu.memory_space<vmem>>, vector<8x32xf32>,
    %c0_77 = arith.constant 0 : index
    %c0_78 = arith.constant 0 : index
    %217 = vector.load %arg11[%c0_77, %c0_78] : memref<8x32xf32, #tpu.memory_space<vmem>>, vector<8x32xf32>
    tpu.vector_store %arg11[%c0_77, %c0_78], %212 {strides = array<i32>} : memref<8x32xf32, #tpu.memory_space<vmem>>, vector<8x32xf32>,
    %c0_79 = arith.constant 0 : index
    %c0_80 = arith.constant 0 : index
    %218 = vector.load %arg9[%c0_79, %c0_80] : memref<8x32xf32, #tpu.memory_space<vmem>>, vector<8x32xf32>
    tpu.vector_store %arg9[%c0_79, %c0_80], %212 {strides = array<i32>} : memref<8x32xf32, #tpu.memory_space<vmem>>, vector<8x32xf32>,
    return
  }
  func.func @transform_0(%arg0: i32, %arg1: i32) -> (i32, i32, i32) {
    %c0_i32 = arith.constant 0 : i32
    %c0_i32_0 = arith.constant 0 : i32
    return %arg1, %arg0, %c0_i32 : i32, i32, i32
  }
  func.func @transform_1(%arg0: i32, %arg1: i32) -> (i32, i32) {
    %c0_i32 = arith.constant 0 : i32
    %c0_i32_0 = arith.constant 0 : i32
    %c0_i32_1 = arith.constant 0 : i32
    return %c0_i32, %c0_i32_0 : i32, i32
  }
  func.func @transform_2(%arg0: i32, %arg1: i32) -> (i32, i32) {
    %c0_i32 = arith.constant 0 : i32
    %c0_i32_0 = arith.constant 0 : i32
    %c0_i32_1 = arith.constant 0 : i32
    return %c0_i32, %c0_i32_0 : i32, i32
  }
  func.func @transform_3(%arg0: i32, %arg1: i32) -> (i32, i32) {
    %c0_i32 = arith.constant 0 : i32
    %c0_i32_0 = arith.constant 0 : i32
    %c0_i32_1 = arith.constant 0 : i32
    return %c0_i32, %c0_i32_0 : i32, i32
  }
  func.func @transform_4(%arg0: i32, %arg1: i32) -> (i32, i32) {
    %c0_i32 = arith.constant 0 : i32
    %c0_i32_0 = arith.constant 0 : i32
    return %arg0, %c0_i32 : i32, i32
  }
  func.func @transform_5(%arg0: i32, %arg1: i32) -> (i32, i32) {
    %c0_i32 = arith.constant 0 : i32
    %c0_i32_0 = arith.constant 0 : i32
    return %arg0, %c0_i32 : i32, i32
  }
  func.func @transform_6(%arg0: i32, %arg1: i32) -> (i32, i32) {
    %c0_i32 = arith.constant 0 : i32
    return %arg0, %arg1 : i32, i32
  }
  func.func @transform_7(%arg0: i32, %arg1: i32) -> (i32, i32) {
    %c0_i32 = arith.constant 0 : i32
    %c0_i32_0 = arith.constant 0 : i32
    return %arg0, %c0_i32 : i32, i32
  }
}

</mosaic_0001>

<bundles_post_ra>
// kernel: tpu_custom_call.1
= control target key start
LH: loop header
LB: loop body
LE: loop exit
PB: predicated region body
PF: predicated region fallthrough
CT: control target
= control target key end

     0   :  { %13 = vsyncpa [#allocation5], 0  ;;  %s2459_s0 = inlined_call_operand.hbm [shape: f32[8,8,32], index: 0, kind: input, shape index: {}]   ;;  %s2460_s1 = inlined_call_operand.hbm [shape: f32[32,128], index: 1, kind: input, shape index: {}]   ;;  %s2461_s2 = inlined_call_operand.hbm [shape: f32[32,128], index: 2, kind: input, shape index: {}]   ;;  %s2462_s3 = inlined_call_operand.vmem [shape: f32[1,128], index: 3, kind: input, shape index: {}]   ;;  %s2463_s4 = inlined_call_operand.vmem [shape: f32[8,32], index: 4, kind: input, shape index: {}]   ;;  %s2464_s5 = inlined_call_operand.vmem [shape: f32[8,32], index: 5, kind: input, shape index: {}]   ;;  %s2465_s6 = inlined_call_operand.hbm [shape: f32[8,256], index: 6, kind: output, shape index: {0}]   ;;  %s2466_s7 = inlined_call_operand.hbm [shape: f32[8,32], index: 7, kind: output, shape index: {1}]  }
   0x1   :  { %14 = vsyncpa [#allocation8], 0 }
   0x2   :  { %15 = vsyncpa [#allocation6], 0 }
   0x3   :  { %16 = vsyncpa [#allocation12], 0  ;;  %s2107_s24 = smov [#allocation7]   ;;  %s2108_s26 = smov [#allocation4]  }
   0x4   :  { %s34_s25 = sshll.u32 %s2107_s24, 4  ;;  %s22_s27 = sshll.u32 %s2108_s26, 4  ;;  %s35_s25 = int_to_ptr.vmem [resolvable:$true] %s34_s25  ;;  %s2160_s27 = int_to_ptr.vmem [resolvable:$true] %s22_s27 }
   0x5   :  { %s1989_s30 = scalar_lea.hbm %s2460_s1, 512 }
   0x6   :  { %p1990_p0 = scmp.ne.s32.totalorder %s2460_s1, %s1989_s30  ;;  %p1993_p1 = scmp.lt.u32.totalorder %s1989_s30, %s2460_s1 }
   0x8   :  { %p1995_p2 = pnand %p1993_p1, %p1990_p0 }
   0xa   :  { %1998 = shalt.err (!%p1995_p2)
}
   0xb   :  { %s1999_s12 = scalar_lea.vmem %s35_s25, 512  ;;  %p2004_p4 = scmp.lt.s32.totalorder %s35_s25, %s35_s25 }
   0xc   :  { %p2000_p3 = scmp.ne.s32.totalorder %s35_s25, %s1999_s12  ;;  %p2005_p5 = scmp.lt.s32.totalorder %s1999_s12, %s1999_s12 }
   0xe   :  { %p2006_p6 = por %p2005_p5, %p2004_p4 }
  0x10   :  { %p2007_p7 = pnand %p2006_p6, %p2000_p3 }
  0x12   :  { %2010 = shalt.err (!%p2007_p7)
}
  0x13   :  { %s2109_s13 = smov 128   ;;  %s2110_s14 = smov 8  }
  0x14   :  { %40 = dma.hbm_to_vmem [thread:$0]  %s2460_s1, 512, %s35_s25, [#allocation8], %s2109_s13, %s2109_s13, %s2110_s14  }
  0x15   :  { %s2011_s19 = scalar_lea.hbm %s2459_s0, 1024 }
  0x16   :  { %p2012_p8 = scmp.ne.s32.totalorder %s2459_s0, %s2011_s19  ;;  %p2015_p9 = scmp.lt.u32.totalorder %s2011_s19, %s2459_s0 }
  0x18   :  { %p2017_p10 = pnand %p2015_p9, %p2012_p8 }
  0x1a   :  { %2020 = shalt.err (!%p2017_p10)
}
  0x1b   :  { %s2021_s24 = scalar_lea.vmem %s2160_s27, 1024  ;;  %p2026_p12 = scmp.lt.s32.totalorder %s2160_s27, %s2160_s27 }
  0x1c   :  { %p2022_p11 = scmp.ne.s32.totalorder %s2160_s27, %s2021_s24  ;;  %p2027_p13 = scmp.lt.s32.totalorder %s2021_s24, %s2021_s24 }
  0x1e   :  { %p2028_p0 = por %p2027_p13, %p2026_p12 }
  0x20   :  { %p2029_p1 = pnand %p2028_p0, %p2022_p11 }
  0x22   :  { %2032 = shalt.err (!%p2029_p1)
}
  0x23   :  { %28 = dma.hbm_to_vmem [thread:$0]  %s2459_s0, 1024, %s2160_s27, [#allocation5], %s2109_s13, %s2109_s13, %s2110_s14  }
  0x24   :  { %s2111_s26 = smov [#allocation9]   ;;  %s2033_s8 = scalar_lea.hbm %s2461_s2, 512 }
  0x25   :  { %s46_s28 = sshll.u32 %s2111_s26, 4  ;;  %p2034_p2 = scmp.ne.s32.totalorder %s2461_s2, %s2033_s8  ;;  %s47_s28 = int_to_ptr.vmem [resolvable:$true] %s46_s28 }
  0x26   :  { %p2037_p3 = scmp.lt.u32.totalorder %s2033_s8, %s2461_s2 }
  0x28   :  { %p2039_p4 = pnand %p2037_p3, %p2034_p2 }
  0x2a   :  { %2042 = shalt.err (!%p2039_p4)
}
  0x2b   :  { %s2043_s15 = scalar_lea.vmem %s47_s28, 512  ;;  %p2048_p6 = scmp.lt.s32.totalorder %s47_s28, %s47_s28 }
  0x2c   :  { %p2044_p5 = scmp.ne.s32.totalorder %s47_s28, %s2043_s15  ;;  %p2049_p7 = scmp.lt.s32.totalorder %s2043_s15, %s2043_s15 }
  0x2e   :  { %p2050_p8 = por %p2049_p7, %p2048_p6 }
  0x30   :  { %p2051_p9 = pnand %p2050_p8, %p2044_p5 }
  0x32   :  { %2054 = shalt.err (!%p2051_p9)
}
  0x33   :  { %52 = dma.hbm_to_vmem [thread:$0]  %s2461_s2, 512, %s47_s28, [#allocation8], %s2109_s13, %s2109_s13, %s2110_s14  }
  0x34   :  { %2099 = dma.done.wait [#allocation5], 1024  }
  0x35   :  { %2100 = vsyncadd [#allocation5], 4294966272 }
  0x36   :  { %2101 = dma.done.wait [#allocation8], 1024  }
  0x37   :  { %2102 = vsyncadd [#allocation8], 4294966272  ;;  %v2112_v0 = vmov 0.0|0.0   ;;  %vm2113_vm0 = vmmov 0   ;;  %v2114_v1 = vmov 0.0   ;;  %v83_v2 = vld [vmem:[#allocation9] sm:$0xff]  ;;  %v87_v26 = vlaneseq }
  0x38   :  { %1832 = vmatprep.subr.bf16.mxu0 %v2112_v0  ;;  %1838 = vmatprep.subr.bf16.mxu1 %v2112_v0  ;;  %v84_v3 = vld [vmem:[#allocation9 + $0x8] sm:$0xff]  ;;  %v79_v4 = vld [vmem:[#allocation7] sm:$0xff]  ;;  %vm73_vm1 = vcmask 261120   ;;  %v85_v7 = vld [vmem:[#allocation9 + $0x10] sm:$0xff]  ;;  %s2117_s18 = smov 96   ;;  %vm455_vm5 = vcmask 523520  }
  0x39   :  { %1664 = vmatprep.mubr.msk.f32.mxu0 %vm2113_vm0, %v2114_v1  ;;  %1675 = vmatprep.mubr.msk.f32.mxu1 %vm2113_vm0, %v2114_v1  ;;  %v2218_v5 = vpack.c.bf16 %v84_v3, %v83_v2  ;;  %v80_v6 = vld [vmem:[#allocation7 + $0x8] sm:$0xff]  ;;  %v86_v8 = vld [vmem:[#allocation9 + $0x18] sm:$0xff]  ;;  %v81_v10 = vld [vmem:[#allocation7 + $0x10] sm:$0xff]  ;;  %v88_v27 = vand.u32 127, %v87_v26  ;;  %vm634_vm6 = vcmask 785920   ;;  %vm809_vm7 = vcmask 1048320  }
  0x3a   :  { %v2220_v9 = vpack.c.bf16 %v80_v6, %v79_v4  ;;  %v82_v11 = vld [vmem:[#allocation7 + $0x18] sm:$0xff]  ;;  %v72_v12 = vld [vmem:[%s2463_s4] sm:$0xff]  ;;  %v2226_v13 = vpack.c.bf16 %v86_v8, %v85_v7  ;;  %v99_v15 = vld [vmem:[#allocation4] sm:$0xff]  ;;  %s2118_s19 = smov [#allocation11]  }
  0x3b   :  { %1834 = vmatpush3.bf16.msra.mxu0 %v2218_v5  ;;  %74 = vst.msk [vmem:[#allocation2] sm:$0xff] %vm73_vm1, %v72_v12  ;;  %v2231_v14 = vpack.c.bf16 %v82_v11, %v81_v10  ;;  %v75_v17 = vld [vmem:[%s2464_s5] sm:$0xff]  ;;  %vm89_vm2 = vcmp.ge.s32.totalorder %v88_v27, 64  ;;  %vm90_vm3 = vcmp.lt.s32.totalorder %v88_v27, 96  ;;  %s2116_s5 = smov 32   ;;  %v281_v41 = vld [vmem:[#allocation4 + $0x8] sm:$0xff] }
  0x3c   :  { %1840 = vmatpush3.bf16.msra.mxu1 %v2220_v9  ;;  %1835 = vmatprep.subr.bf16.mxu0 %v2112_v0  ;;  %76 = vst.msk [vmem:[#allocation3] sm:$0xff] %vm73_vm1, %v75_v17  ;;  %v2259_v19 = vld [vmem:[%s2462_s3] ss:$0 sm:$0xff]  ;;  %vm2262_vm4 = vmand %vm89_vm2, %vm90_vm3  ;;  %s2115_s3 = smov 64   ;;  %s1545_s20 = sshll.u32 %s2118_s19, 4  ;;  %s1546_s20 = int_to_ptr.vmem [resolvable:$true] %s1545_s20 }
  0x3d   :  { %1841 = vmatprep.subr.bf16.mxu1 %v2112_v0  ;;  %v458_v63 = vld [vmem:[#allocation4 + $0x10] sm:$0xff]  ;;  %s2055_s21 = scalar_lea.vmem %s1546_s20, 128  ;;  %p2060_p11 = scmp.lt.s32.totalorder %s1546_s20, %s1546_s20 }
  0x3e   :  { %p2056_p10 = scmp.ne.s32.totalorder %s1546_s20, %s2055_s21  ;;  %p2061_p12 = scmp.lt.s32.totalorder %s2055_s21, %s2055_s21 }
  0x3f   :  { %1837 = vmatpush3.bf16.msra.mxu0 %v2226_v13 }
  0x40   :  { %1843 = vmatpush3.bf16.msra.mxu1 %v2231_v14  ;;  %1844 = vmatprep.subr.bf16.mxu0 %v2112_v0  ;;  %p2062_p13 = por %p2061_p12, %p2060_p11 }
  0x41   :  { %1850 = vmatprep.subr.bf16.mxu1 %v2112_v0 }
  0x42   :  { %v77_v16 = vld [vmem:[#allocation2] sm:$0xff]  ;;  %p2063_p0 = pnand %p2062_p13, %p2056_p10 }
  0x43   :  { %1665 = vmatmul.mubr.msk.f32.vlgmr.msra.gmra.mrb[0].mxu0 %vm73_vm1, %v77_v16  ;;  %1676 = vmatmul.mubr.msk.f32.vlgmr.msra.gmra.mrb[0].mxu1 %vm73_vm1, %v99_v15  ;;  %v78_v34 = vld [vmem:[#allocation3] sm:$0xff] }
  0x44   :  { %1852 = vmatpush3.bf16.msra.mxu1 %v2220_v9  ;;  %1846 = vmatpush3.bf16.msra.mxu0 %v2218_v5 }
  0x45   :  { %1853 = vmatprep.subr.bf16.mxu1 %v2112_v0  ;;  %1847 = vmatprep.subr.bf16.mxu0 %v2112_v0 }
  0x46   :  { %1697 = vmatprep.mubr.msk.f32.mxu1 %vm2113_vm0, %v2114_v1  ;;  %1686 = vmatprep.mubr.msk.f32.mxu0 %vm2113_vm0, %v2114_v1 }
  0x48   :  { %1855 = vmatpush3.bf16.msra.mxu1 %v2231_v14  ;;  %1849 = vmatpush3.bf16.msra.mxu0 %v2226_v13 }
  0x49   :  { %1862 = vmatprep.subr.bf16.mxu1 %v2112_v0  ;;  %1856 = vmatprep.subr.bf16.mxu0 %v2112_v0 }
  0x4b   :  { %1698 = vmatmul.mubr.msk.f32.vlgmr.msra.gmra.mrb[2].mxu1 %vm73_vm1, %v281_v41 }
  0x4c   :  { %1864 = vmatpush3.bf16.msra.mxu1 %v2220_v9  ;;  %1719 = vmatprep.mubr.msk.f32.mxu1 %vm2113_vm0, %v2114_v1 }
  0x4d   :  { %1865 = vmatprep.subr.bf16.mxu1 %v2112_v0 }
  0x50   :  { %1867 = vmatpush3.bf16.msra.mxu1 %v2231_v14 }
  0x51   :  { %1874 = vmatprep.subr.bf16.mxu1 %v2112_v0 }
  0x53   :  { %1720 = vmatmul.mubr.msk.f32.vlgmr.msra.gmra.mrb[4].mxu1 %vm73_vm1, %v458_v63 }
  0x54   :  { %1876 = vmatpush3.bf16.msra.mxu1 %v2220_v9  ;;  %1741 = vmatprep.mubr.msk.f32.mxu1 %vm2113_vm0, %v2114_v1 }
  0x55   :  { %1877 = vmatprep.subr.bf16.mxu1 %v2112_v0 }
  0x58   :  { %1879 = vmatpush3.bf16.msra.mxu1 %v2231_v14 }
  0x59   :  { %1886 = vmatprep.subr.bf16.mxu1 %v2112_v0 }
 0x116   :  { %v170_v18 = vpop.f32.mrb[0].mxu0  ;;  %v243_v20 = vpop.f32.mrb[0].mxu1 }
 0x117   :  { %v244_v21 = vadd.f32 %v243_v20, %v170_v18  ;;  %v1666_v22 = vpop.f32.mrb[1].mxu0  ;;  %v1677_v23 = vpop.f32.mrb[1].mxu1 }
 0x119   :  { %v247_v24 = vadd.f32 %v2259_v19, %v244_v21 }
 0x11b   :  { %v248_v25 = vmul.f32 0.5, %v247_v24 }
 0x11d   :  { %1941 = vtanh.f32 %v248_v25 }
 0x11e   :  { %1943 = vtanh.f32 %v247_v24  ;;  %v423_v45 = vpop.f32.mrb[2].mxu1 }
 0x11f   :  { %v1699_v46 = vpop.f32.mrb[3].mxu1 }
 0x126   :  { %v602_v6 = vpop.f32.mrb[4].mxu1 }
 0x127   :  { %v1942_v28 = vpop.eup %1941  ;;  %v1721_v7 = vpop.f32.mrb[5].mxu1 }
 0x128   :  { %v250_v29 = vadd.f32 1.0, %v1942_v28  ;;  %v1944_v32 = vpop.eup %1943  ;;  %v637_v28 = vld [vmem:[#allocation4 + $0x18] sm:$0xff] }
 0x129   :  { %1742 = vmatmul.mubr.msk.f32.vlgmr.msra.gmra.mrb[6].mxu1 %vm73_vm1, %v637_v28 }
 0x12a   :  { %v251_v31 = vmul.f32 0.5, %v250_v29  ;;  %1888 = vmatpush3.bf16.msra.mxu1 %v2220_v9  ;;  %1763 = vmatprep.mubr.msk.f32.mxu1 %vm2113_vm0, %v2114_v1 }
 0x12b   :  { %1889 = vmatprep.subr.bf16.mxu1 %v2112_v0 }
 0x12c   :  { %v253_v33 = vsel %vm2262_vm4, %v1944_v32, %v251_v31 }
 0x12d   :  { %260 = vrot.lane.b32.xlu0 %v253_v33, %s2115_s3 }
 0x12e   :  { %1891 = vmatpush3.bf16.msra.mxu1 %v2231_v14 }
 0x12f   :  { %1898 = vmatprep.subr.bf16.mxu1 %v2112_v0 }
 0x131   :  { %255 = vrot.lane.b32.xlu0 %v78_v34, %s2116_s5 }
 0x19f   :  { %v261_v35 = vpop.permute.xlu0 %260 }
 0x1a0   :  { %v263_v36 = vmul.f32 %v261_v35, %v253_v33 }
 0x1a2   :  { %265 = vrot.lane.b32.xlu1 %v263_v36, %s2116_s5 }
 0x1a3   :  { %v256_v37 = vpop.permute.xlu0 %255 }
 0x1a4   :  { %v258_v38 = vmul.f32 %v256_v37, %v253_v33 }
 0x214   :  { %v266_v39 = vpop.permute.xlu1 %265 }
 0x215   :  { %v268_v40 = vadd.f32 %v266_v39, %v258_v38 }
 0x217   :  { %1945 = vtanh.f32 %v268_v40 }
 0x221   :  { %v1946_v42 = vpop.eup %1945 }
 0x222   :  { %271 = vrot.lane.b32.xlu1 %v1946_v42, %s2115_s3 }
 0x294   :  { %v272_v43 = vpop.permute.xlu1 %271 }
 0x295   :  { %v274_v44 = vmul.f32 %v272_v43, %v253_v33  ;;  %v781_v33 = vpop.f32.mrb[6].mxu1 }
 0x296   :  { %v1743_v34 = vpop.f32.mrb[7].mxu1 }
 0x297   :  { %276 = vrot.lane.b32.xlu0 %v274_v44, %s2116_s5 }
 0x309   :  { %v277_v47 = vpop.permute.xlu0 %276 }
 0x30a   :  { %279 = vst.msk [vmem:[#allocation10] sm:$0xff] %vm73_vm1, %v277_v47  ;;  %1687 = vmatmul.mubr.msk.f32.vlgmr.msra.gmra.mrb[2].mxu0 %vm73_vm1, %v277_v47 }
 0x30b   :  { %1858 = vmatpush3.bf16.msra.mxu0 %v2218_v5  ;;  %1708 = vmatprep.mubr.msk.f32.mxu0 %vm2113_vm0, %v2114_v1 }
 0x30c   :  { %1859 = vmatprep.subr.bf16.mxu0 %v2112_v0 }
 0x30f   :  { %1861 = vmatpush3.bf16.msra.mxu0 %v2226_v13 }
 0x310   :  { %1868 = vmatprep.subr.bf16.mxu0 %v2112_v0 }
 0x3dd   :  { %v350_v48 = vpop.f32.mrb[2].mxu0 }
 0x3de   :  { %v424_v49 = vadd.f32 %v423_v45, %v350_v48  ;;  %v1688_v50 = vpop.f32.mrb[3].mxu0 }
 0x3e0   :  { %v427_v51 = vadd.f32 %v2259_v19, %v424_v49 }
 0x3e2   :  { %v428_v52 = vmul.f32 0.5, %v427_v51 }
 0x3e4   :  { %1947 = vtanh.f32 %v428_v52 }
 0x3e5   :  { %1949 = vtanh.f32 %v427_v51  ;;  %v812_v51 = vld [vmem:[#allocation4 + $0x20] sm:$0xff] }
 0x3e6   :  { %1764 = vmatmul.mubr.msk.f32.vlgmr.msra.gmra.mrb[8].mxu1 %vm73_vm1, %v812_v51 }
 0x3e7   :  { %1900 = vmatpush3.bf16.msra.mxu1 %v2220_v9  ;;  %1785 = vmatprep.mubr.msk.f32.mxu1 %vm2113_vm0, %v2114_v1 }
 0x3e8   :  { %1901 = vmatprep.subr.bf16.mxu1 %v2112_v0 }
 0x3eb   :  { %1903 = vmatpush3.bf16.msra.mxu1 %v2231_v14 }
 0x3ec   :  { %1910 = vmatprep.subr.bf16.mxu1 %v2112_v0 }
 0x3ee   :  { %v1948_v53 = vpop.eup %1947 }
 0x3ef   :  { %v430_v54 = vadd.f32 1.0, %v1948_v53  ;;  %v1950_v56 = vpop.eup %1949 }
 0x3f1   :  { %v431_v55 = vmul.f32 0.5, %v430_v54 }
 0x3f3   :  { %v433_v57 = vsel %vm2262_vm4, %v1950_v56, %v431_v55 }
 0x3f4   :  { %436 = vrot.lane.b32.xlu1 %v433_v57, %s2115_s3  ;;  %v434_v60 = vmul.f32 %v433_v57, %v268_v40 }
 0x466   :  { %v437_v58 = vpop.permute.xlu1 %436 }
 0x467   :  { %v439_v59 = vmul.f32 %v437_v58, %v433_v57 }
 0x469   :  { %441 = vrot.lane.b32.xlu0 %v439_v59, %s2116_s5 }
 0x4b9   :  { %v957_v55 = vpop.f32.mrb[8].mxu1 }
 0x4ba   :  { %v1765_v56 = vpop.f32.mrb[9].mxu1 }
 0x4db   :  { %v442_v61 = vpop.permute.xlu0 %441 }
 0x4dc   :  { %v444_v62 = vadd.f32 %v442_v61, %v434_v60 }
 0x4de   :  { %1951 = vtanh.f32 %v444_v62 }
 0x4e8   :  { %v1952_v2 = vpop.eup %1951 }
 0x4e9   :  { %447 = vrot.lane.b32.xlu1 %v1952_v2, %s2115_s3 }
 0x55b   :  { %v448_v3 = vpop.permute.xlu1 %447 }
 0x55c   :  { %v2301_v4 = vmul.f32 %v448_v3, %v433_v57 }
 0x55e   :  { %459 = vrot.lane.b32.xlu0 %v2301_v4, %s2116_s5 }
 0x5d0   :  { %v460_v8 = vpop.permute.xlu0 %459 }
 0x5d1   :  { %1709 = vmatmul.mubr.msk.f32.vlgmr.msra.gmra.mrb[4].mxu0 %vm73_vm1, %v460_v8 }
 0x5d2   :  { %1870 = vmatpush3.bf16.msra.mxu0 %v2218_v5  ;;  %1730 = vmatprep.mubr.msk.f32.mxu0 %vm2113_vm0, %v2114_v1 }
 0x5d3   :  { %1871 = vmatprep.subr.bf16.mxu0 %v2112_v0 }
 0x5d6   :  { %1873 = vmatpush3.bf16.msra.mxu0 %v2226_v13 }
 0x5d7   :  { %1880 = vmatprep.subr.bf16.mxu0 %v2112_v0 }
 0x6a4   :  { %v529_v10 = vpop.f32.mrb[4].mxu0 }
 0x6a5   :  { %v603_v11 = vadd.f32 %v602_v6, %v529_v10  ;;  %v1710_v12 = vpop.f32.mrb[5].mxu0 }
 0x6a7   :  { %v606_v15 = vadd.f32 %v2259_v19, %v603_v11 }
 0x6a9   :  { %v607_v16 = vmul.f32 0.5, %v606_v15 }
 0x6ab   :  { %1953 = vtanh.f32 %v607_v16  ;;  %v991_v16 = vld [vmem:[#allocation4 + $0x28] sm:$0xff] }
 0x6ac   :  { %1955 = vtanh.f32 %v606_v15  ;;  %1786 = vmatmul.mubr.msk.f32.vlgmr.msra.gmra.mrb[10].mxu1 %vm73_vm1, %v991_v16 }
 0x6ad   :  { %1912 = vmatpush3.bf16.msra.mxu1 %v2220_v9  ;;  %1807 = vmatprep.mubr.msk.f32.mxu1 %vm2113_vm0, %v2114_v1 }
 0x6ae   :  { %1913 = vmatprep.subr.bf16.mxu1 %v2112_v0 }
 0x6b1   :  { %1915 = vmatpush3.bf16.msra.mxu1 %v2231_v14 }
 0x6b2   :  { %1922 = vmatprep.subr.bf16.mxu1 %v2112_v0 }
 0x6b5   :  { %v1954_v17 = vpop.eup %1953 }
 0x6b6   :  { %v609_v18 = vadd.f32 1.0, %v1954_v17  ;;  %v1956_v21 = vpop.eup %1955 }
 0x6b8   :  { %v610_v20 = vmul.f32 0.5, %v609_v18 }
 0x6ba   :  { %v612_v22 = vsel %vm2262_vm4, %v1956_v21, %v610_v20 }
 0x6bb   :  { %615 = vrot.lane.b32.xlu1 %v612_v22, %s2115_s3  ;;  %v613_v25 = vmul.f32 %v612_v22, %v444_v62 }
 0x72d   :  { %v616_v23 = vpop.permute.xlu1 %615 }
 0x72e   :  { %v618_v24 = vmul.f32 %v616_v23, %v612_v22 }
 0x730   :  { %620 = vrot.lane.b32.xlu0 %v618_v24, %s2116_s5 }
 0x77f   :  { %v1133_v21 = vpop.f32.mrb[10].mxu1 }
 0x7a2   :  { %v621_v26 = vpop.permute.xlu0 %620 }
 0x7a3   :  { %v623_v27 = vadd.f32 %v621_v26, %v613_v25 }
 0x7a5   :  { %1957 = vtanh.f32 %v623_v27 }
 0x7af   :  { %v1958_v29 = vpop.eup %1957 }
 0x7b0   :  { %626 = vrot.lane.b32.xlu1 %v1958_v29, %s2115_s3 }
 0x822   :  { %v627_v31 = vpop.permute.xlu1 %626 }
 0x823   :  { %v2325_v32 = vmul.f32 %v627_v31, %v612_v22  ;;  %v1787_v22 = vpop.f32.mrb[11].mxu1 }
 0x825   :  { %638 = vrot.lane.b32.xlu0 %v2325_v32, %s2116_s5 }
 0x897   :  { %v639_v35 = vpop.permute.xlu0 %638 }
 0x898   :  { %1731 = vmatmul.mubr.msk.f32.vlgmr.msra.gmra.mrb[6].mxu0 %vm73_vm1, %v639_v35 }
 0x899   :  { %1882 = vmatpush3.bf16.msra.mxu0 %v2218_v5  ;;  %1752 = vmatprep.mubr.msk.f32.mxu0 %vm2113_vm0, %v2114_v1 }
 0x89a   :  { %1883 = vmatprep.subr.bf16.mxu0 %v2112_v0 }
 0x89d   :  { %1885 = vmatpush3.bf16.msra.mxu0 %v2226_v13 }
 0x89e   :  { %1892 = vmatprep.subr.bf16.mxu0 %v2112_v0 }
 0x96b   :  { %v708_v36 = vpop.f32.mrb[6].mxu0 }
 0x96c   :  { %v782_v37 = vadd.f32 %v781_v33, %v708_v36  ;;  %v1732_v38 = vpop.f32.mrb[7].mxu0 }
 0x96e   :  { %v785_v39 = vadd.f32 %v2259_v19, %v782_v37 }
 0x970   :  { %v786_v40 = vmul.f32 0.5, %v785_v39 }
 0x972   :  { %1959 = vtanh.f32 %v786_v40 }
 0x973   :  { %1961 = vtanh.f32 %v785_v39 }
 0x97c   :  { %v1960_v41 = vpop.eup %1959 }
 0x97d   :  { %v788_v42 = vadd.f32 1.0, %v1960_v41  ;;  %v1962_v44 = vpop.eup %1961  ;;  %v1167_v41 = vld [vmem:[#allocation4 + $0x30] sm:$0xff] }
 0x97e   :  { %1808 = vmatmul.mubr.msk.f32.vlgmr.msra.gmra.mrb[12].mxu1 %vm73_vm1, %v1167_v41 }
 0x97f   :  { %v789_v43 = vmul.f32 0.5, %v788_v42  ;;  %1924 = vmatpush3.bf16.msra.mxu1 %v2220_v9  ;;  %1829 = vmatprep.mubr.msk.f32.mxu1 %vm2113_vm0, %v2114_v1 }
 0x980   :  { %1925 = vmatprep.subr.bf16.mxu1 %v2112_v0 }
 0x981   :  { %v791_v45 = vsel %vm2262_vm4, %v1962_v44, %v789_v43 }
 0x982   :  { %794 = vrot.lane.b32.xlu1 %v791_v45, %s2115_s3  ;;  %v792_v48 = vmul.f32 %v791_v45, %v623_v27 }
 0x983   :  { %1927 = vmatpush3.bf16.msra.mxu1 %v2231_v14 }
 0x9f4   :  { %v795_v46 = vpop.permute.xlu1 %794 }
 0x9f5   :  { %v797_v47 = vmul.f32 %v795_v46, %v791_v45 }
 0x9f7   :  { %799 = vrot.lane.b32.xlu0 %v797_v47, %s2116_s5 }
 0xa69   :  { %v800_v49 = vpop.permute.xlu0 %799 }
 0xa6a   :  { %v802_v50 = vadd.f32 %v800_v49, %v792_v48 }
 0xa6c   :  { %1963 = vtanh.f32 %v802_v50 }
 0xa76   :  { %v1964_v52 = vpop.eup %1963 }
 0xa77   :  { %805 = vrot.lane.b32.xlu1 %v1964_v52, %s2115_s3 }
 0xae9   :  { %v806_v53 = vpop.permute.xlu1 %805 }
 0xaea   :  { %v2349_v54 = vmul.f32 %v806_v53, %v791_v45  ;;  %v1311_v45 = vpop.f32.mrb[12].mxu1 }
 0xaeb   :  { %v1809_v46 = vpop.f32.mrb[13].mxu1 }
 0xaec   :  { %814 = vrot.lane.b32.xlu0 %v2349_v54, %s2116_s5 }
 0xb5e   :  { %v815_v57 = vpop.permute.xlu0 %814 }
 0xb5f   :  { %1753 = vmatmul.mubr.msk.f32.vlgmr.msra.gmra.mrb[8].mxu0 %vm73_vm1, %v815_v57 }
 0xb60   :  { %1894 = vmatpush3.bf16.msra.mxu0 %v2218_v5  ;;  %1774 = vmatprep.mubr.msk.f32.mxu0 %vm2113_vm0, %v2114_v1 }
 0xb61   :  { %1895 = vmatprep.subr.bf16.mxu0 %v2112_v0 }
 0xb64   :  { %1897 = vmatpush3.bf16.msra.mxu0 %v2226_v13 }
 0xb65   :  { %1904 = vmatprep.subr.bf16.mxu0 %v2112_v0 }
 0xc32   :  { %v884_v58 = vpop.f32.mrb[8].mxu0 }
 0xc33   :  { %v958_v59 = vadd.f32 %v957_v55, %v884_v58  ;;  %v1754_v60 = vpop.f32.mrb[9].mxu0  ;;  %v1345_v58 = vld [vmem:[#allocation4 + $0x38] sm:$0xff] }
 0xc34   :  { %1830 = vmatmul.mubr.msk.f32.vlgmr.msra.gmra.mrb[14].mxu1 %vm73_vm1, %v1345_v58 }
 0xc35   :  { %v961_v61 = vadd.f32 %v2259_v19, %v958_v59 }
 0xc37   :  { %v962_v62 = vmul.f32 0.5, %v961_v61 }
 0xc39   :  { %1965 = vtanh.f32 %v962_v62 }
 0xc3a   :  { %1967 = vtanh.f32 %v961_v61 }
 0xc43   :  { %v1966_v63 = vpop.eup %1965 }
 0xc44   :  { %v964_v2 = vadd.f32 1.0, %v1966_v63  ;;  %v1968_v6 = vpop.eup %1967 }
 0xc46   :  { %v965_v3 = vmul.f32 0.5, %v964_v2 }
 0xc48   :  { %v967_v7 = vsel %vm2262_vm4, %v1968_v6, %v965_v3 }
 0xc49   :  { %970 = vrot.lane.b32.xlu1 %v967_v7, %s2115_s3  ;;  %v968_v11 = vmul.f32 %v967_v7, %v802_v50 }
 0xcbb   :  { %v971_v8 = vpop.permute.xlu1 %970 }
 0xcbc   :  { %v973_v10 = vmul.f32 %v971_v8, %v967_v7 }
 0xcbe   :  { %975 = vrot.lane.b32.xlu0 %v973_v10, %s2116_s5 }
 0xd07   :  { %v1489_v62 = vpop.f32.mrb[14].mxu1 }
 0xd08   :  { %v1831_v63 = vpop.f32.mrb[15].mxu1 }
 0xd30   :  { %v976_v12 = vpop.permute.xlu0 %975 }
 0xd31   :  { %v978_v15 = vadd.f32 %v976_v12, %v968_v11 }
 0xd33   :  { %1969 = vtanh.f32 %v978_v15 }
 0xd3d   :  { %v1970_v17 = vpop.eup %1969 }
 0xd3e   :  { %981 = vrot.lane.b32.xlu1 %v1970_v17, %s2115_s3 }
 0xdb0   :  { %v982_v18 = vpop.permute.xlu1 %981 }
 0xdb1   :  { %v984_v20 = vmul.f32 %v982_v18, %v967_v7 }
 0xdb3   :  { %986 = vrot.lane.b32.xlu0 %v984_v20, %s2116_s5 }
 0xe25   :  { %v987_v23 = vpop.permute.xlu0 %986 }
 0xe26   :  { %989 = vst.msk [vmem:[#allocation10 + $0x8] sm:$0xff] %vm73_vm1, %v987_v23  ;;  %1775 = vmatmul.mubr.msk.f32.vlgmr.msra.gmra.mrb[10].mxu0 %vm73_vm1, %v987_v23 }
 0xe27   :  { %1906 = vmatpush3.bf16.msra.mxu0 %v2218_v5  ;;  %1796 = vmatprep.mubr.msk.f32.mxu0 %vm2113_vm0, %v2114_v1 }
 0xe28   :  { %1907 = vmatprep.subr.bf16.mxu0 %v2112_v0 }
 0xe2b   :  { %1909 = vmatpush3.bf16.msra.mxu0 %v2226_v13 }
 0xe2c   :  { %1916 = vmatprep.subr.bf16.mxu0 %v2112_v0 }
 0xef9   :  { %v1060_v24 = vpop.f32.mrb[10].mxu0 }
 0xefa   :  { %v1134_v25 = vadd.f32 %v1133_v21, %v1060_v24  ;;  %v1776_v26 = vpop.f32.mrb[11].mxu0 }
 0xefc   :  { %v1137_v27 = vadd.f32 %v2259_v19, %v1134_v25 }
 0xefe   :  { %v1138_v28 = vmul.f32 0.5, %v1137_v27 }
 0xf00   :  { %1971 = vtanh.f32 %v1138_v28 }
 0xf01   :  { %1973 = vtanh.f32 %v1137_v27 }
 0xf0a   :  { %v1972_v29 = vpop.eup %1971 }
 0xf0b   :  { %v1140_v31 = vadd.f32 1.0, %v1972_v29  ;;  %v1974_v34 = vpop.eup %1973 }
 0xf0d   :  { %v1141_v33 = vmul.f32 0.5, %v1140_v31 }
 0xf0f   :  { %v1143_v35 = vsel %vm2262_vm4, %v1974_v34, %v1141_v33 }
 0xf10   :  { %1146 = vrot.lane.b32.xlu1 %v1143_v35, %s2115_s3  ;;  %v1144_v38 = vmul.f32 %v1143_v35, %v978_v15 }
 0xf82   :  { %v1147_v36 = vpop.permute.xlu1 %1146 }
 0xf83   :  { %v1149_v37 = vmul.f32 %v1147_v36, %v1143_v35 }
 0xf85   :  { %1151 = vrot.lane.b32.xlu0 %v1149_v37, %s2116_s5 }
 0xff7   :  { %v1152_v39 = vpop.permute.xlu0 %1151 }
 0xff8   :  { %v1154_v40 = vadd.f32 %v1152_v39, %v1144_v38 }
 0xffa   :  { %1975 = vtanh.f32 %v1154_v40 }
0x1004   :  { %v1976_v42 = vpop.eup %1975 }
0x1005   :  { %1157 = vrot.lane.b32.xlu1 %v1976_v42, %s2115_s3 }
0x1077   :  { %v1158_v43 = vpop.permute.xlu1 %1157 }
0x1078   :  { %v2394_v44 = vmul.f32 %v1158_v43, %v1143_v35 }
0x107a   :  { %1168 = vrot.lane.b32.xlu0 %v2394_v44, %s2116_s5 }
0x10ec   :  { %v1169_v47 = vpop.permute.xlu0 %1168 }
0x10ed   :  { %1797 = vmatmul.mubr.msk.f32.vlgmr.msra.gmra.mrb[12].mxu0 %vm73_vm1, %v1169_v47 }
0x10ee   :  { %1918 = vmatpush3.bf16.msra.mxu0 %v2218_v5  ;;  %1818 = vmatprep.mubr.msk.f32.mxu0 %vm2113_vm0, %v2114_v1 }
0x10ef   :  { %1919 = vmatprep.subr.bf16.mxu0 %v2112_v0 }
0x10f2   :  { %1921 = vmatpush3.bf16.msra.mxu0 %v2226_v13 }
0x11c0   :  { %v1238_v9 = vpop.f32.mrb[12].mxu0 }
0x11c1   :  { %v1312_v14 = vadd.f32 %v1311_v45, %v1238_v9  ;;  %v1798_v48 = vpop.f32.mrb[13].mxu0 }
0x11c3   :  { %v1315_v49 = vadd.f32 %v2259_v19, %v1312_v14 }
0x11c5   :  { %v1316_v50 = vmul.f32 0.5, %v1315_v49 }
0x11c7   :  { %1977 = vtanh.f32 %v1316_v50 }
0x11c8   :  { %1979 = vtanh.f32 %v1315_v49 }
0x11d1   :  { %v1978_v51 = vpop.eup %1977 }
0x11d2   :  { %v1318_v52 = vadd.f32 1.0, %v1978_v51  ;;  %v1980_v55 = vpop.eup %1979 }
0x11d4   :  { %v1319_v53 = vmul.f32 0.5, %v1318_v52 }
0x11d6   :  { %v1321_v5 = vsel %vm2262_vm4, %v1980_v55, %v1319_v53 }
0x11d7   :  { %1324 = vrot.lane.b32.xlu1 %v1321_v5, %s2115_s3  ;;  %v1322_v13 = vmul.f32 %v1321_v5, %v1154_v40 }
0x1249   :  { %v1325_v0 = vpop.permute.xlu1 %1324 }
0x124a   :  { %v1327_v1 = vmul.f32 %v1325_v0, %v1321_v5 }
0x124c   :  { %1329 = vrot.lane.b32.xlu0 %v1327_v1, %s2116_s5 }
0x12be   :  { %v1330_v56 = vpop.permute.xlu0 %1329 }
0x12bf   :  { %v1332_v57 = vadd.f32 %v1330_v56, %v1322_v13 }
0x12c1   :  { %1981 = vtanh.f32 %v1332_v57 }
0x12cb   :  { %v1982_v59 = vpop.eup %1981 }
0x12cc   :  { %1335 = vrot.lane.b32.xlu1 %v1982_v59, %s2115_s3 }
0x133e   :  { %v1336_v60 = vpop.permute.xlu1 %1335 }
0x133f   :  { %v1338_v61 = vmul.f32 %v1336_v60, %v1321_v5 }
0x1341   :  { %1346 = vrot.lane.b32.xlu0 %v1338_v61, %s2116_s5 }
0x13b3   :  { %v1347_v2 = vpop.permute.xlu0 %1346 }
0x13b4   :  { %1819 = vmatmul.mubr.msk.f32.vlgmr.msra.gmra.mrb[14].mxu0 %vm73_vm1, %v1347_v2 }
0x1487   :  { %v1416_v3 = vpop.f32.mrb[14].mxu0 }
0x1488   :  { %v1490_v6 = vadd.f32 %v1489_v62, %v1416_v3  ;;  %v1820_v7 = vpop.f32.mrb[15].mxu0 }
0x148a   :  { %v1493_v8 = vadd.f32 %v2259_v19, %v1490_v6 }
0x148c   :  { %v1494_v10 = vmul.f32 0.5, %v1493_v8 }
0x148e   :  { %1983 = vtanh.f32 %v1494_v10 }
0x148f   :  { %1985 = vtanh.f32 %v1493_v8 }
0x1498   :  { %v1984_v11 = vpop.eup %1983 }
0x1499   :  { %v1496_v12 = vadd.f32 1.0, %v1984_v11  ;;  %v1986_v16 = vpop.eup %1985 }
0x149b   :  { %v1497_v15 = vmul.f32 0.5, %v1496_v12 }
0x149d   :  { %v1499_v17 = vsel %vm2262_vm4, %v1986_v16, %v1497_v15 }
0x149e   :  { %1502 = vrot.lane.b32.xlu1 %v1499_v17, %s2115_s3  ;;  %v1500_v19 = vmul.f32 %v1499_v17, %v1332_v57 }
0x1510   :  { %v1503_v18 = vpop.permute.xlu1 %1502 }
0x1511   :  { %v1505_v20 = vmul.f32 %v1503_v18, %v1499_v17 }
0x1513   :  { %1507 = vrot.lane.b32.xlu0 %v1505_v20, %s2116_s5 }
0x1517   :  { %452 = vrot.lane.b32.xlu0 %v2301_v4, %s2115_s3 }
0x151b   :  { %631 = vrot.lane.b32.xlu0 %v2325_v32, %s2117_s18 }
0x1585   :  { %v1508_v21 = vpop.permute.xlu0 %1507 }
0x1586   :  { %v1510_v22 = vadd.f32 %v1508_v21, %v1500_v19 }
0x1588   :  { %1987 = vtanh.f32 %v1510_v22  ;;  %1524 = vrot.lane.b32.xlu0 %v1510_v22, %s2117_s18 }
0x1589   :  { %v453_v30 = vpop.permute.xlu0 %452 }
0x158a   :  { %456 = vst.msk [vmem:[#allocation10] sm:$0xff] %vm455_vm5, %v453_v30 }
0x158d   :  { %v632_v23 = vpop.permute.xlu0 %631 }
0x158e   :  { %635 = vst.msk [vmem:[#allocation10] sm:$0xff] %vm634_vm6, %v632_v23 }
0x158f   :  { %810 = vst.msk [vmem:[#allocation10] sm:$0xff] %vm809_vm7, %v2349_v54 }
0x1592   :  { %v1988_v4 = vpop.eup %1987 }
0x1593   :  { %1513 = vrot.lane.b32.xlu1 %v1988_v4, %s2115_s3 }
0x1597   :  { %1162 = vrot.lane.b32.xlu1 %v2394_v44, %s2115_s3 }
0x159b   :  { %1340 = vrot.lane.b32.xlu1 %v1338_v61, %s2117_s18 }
0x15fa   :  { %v1525_v32 = vpop.permute.xlu0 %1524 }
0x15fb   :  { %1527 = vst.msk [vmem:[#allocation3] sm:$0xff] %vm73_vm1, %v1525_v32  ;;  %1528 = vst.msk [vmem:[#allocation11] sm:$0xff] %vm73_vm1, %v1525_v32 }
0x15fc   :  { %2066 = shalt.err (!%p2063_p0)
}
0x15fd   :  { %s2067_s24 = scalar_lea.hbm %s2466_s7, 128 }
0x15fe   :  { %p2068_p1 = scmp.ne.s32.totalorder %s2466_s7, %s2067_s24  ;;  %p2071_p2 = scmp.lt.u32.totalorder %s2067_s24, %s2466_s7 }
0x1600   :  { %p2073_p3 = pnand %p2071_p2, %p2068_p1 }
0x1602   :  { %2076 = shalt.err (!%p2073_p3)
}
0x1603   :  { %1548 = dma.vmem_to_hbm [thread:$0]  %s1546_s20, 128, %s2466_s7, [#allocation12]  }
0x1604   :  { %s2119_s8 = smov [#allocation10]  }
0x1605   :  { %v1514_v54 = vpop.permute.xlu1 %1513  ;;  %s1535_s9 = sshll.u32 %s2119_s8, 4  ;;  %s1536_s9 = int_to_ptr.vmem [resolvable:$true] %s1535_s9 }
0x1606   :  { %v1516_v24 = vmul.f32 %v1514_v54, %v1499_v17  ;;  %s2077_s10 = scalar_lea.vmem %s1536_s9, 256  ;;  %p2082_p5 = scmp.lt.s32.totalorder %s1536_s9, %s1536_s9 }
0x1607   :  { %p2078_p4 = scmp.ne.s32.totalorder %s1536_s9, %s2077_s10  ;;  %p2083_p6 = scmp.lt.s32.totalorder %s2077_s10, %s2077_s10 }
0x1608   :  { %1519 = vrot.lane.b32.xlu1 %v1516_v24, %s2116_s5 }
0x1609   :  { %v1163_v25 = vpop.permute.xlu1 %1162  ;;  %p2084_p7 = por %p2083_p6, %p2082_p5 }
0x160a   :  { %1165 = vst.msk [vmem:[#allocation10 + $0x8] sm:$0xff] %vm455_vm5, %v1163_v25 }
0x160b   :  { %p2085_p8 = pnand %p2084_p7, %p2078_p4 }
0x160d   :  { %v1341_v26 = vpop.permute.xlu1 %1340 }
0x160e   :  { %1343 = vst.msk [vmem:[#allocation10 + $0x8] sm:$0xff] %vm634_vm6, %v1341_v26 }
0x160f   :  { %1517 = vst.msk [vmem:[#allocation10 + $0x8] sm:$0xff] %vm809_vm7, %v1516_v24 }
0x1610   :  { %2088 = shalt.err (!%p2085_p8)
}
0x1611   :  { %s2089_s12 = scalar_lea.hbm %s2465_s6, 256 }
0x1612   :  { %p2090_p9 = scmp.ne.s32.totalorder %s2465_s6, %s2089_s12  ;;  %p2093_p10 = scmp.lt.u32.totalorder %s2089_s12, %s2465_s6 }
0x1614   :  { %p2095_p11 = pnand %p2093_p10, %p2090_p9 }
0x1616   :  { %2098 = shalt.err (!%p2095_p11)
}
0x1617   :  { %1538 = dma.vmem_to_hbm [thread:$0]  %s1536_s9, 256, %s2465_s6, [#allocation6]  }
0x167a   :  { %v1520_v27 = vpop.permute.xlu1 %1519 }
0x167b   :  { %1522 = vst.msk [vmem:[#allocation2] sm:$0xff] %vm73_vm1, %v1520_v27 }
0x167c   :  { %2103 = dma.done.wait [#allocation6], 256  }
0x167d   :  { %2104 = vsyncadd [#allocation6], 4294967040 }
0x167e   :  { %2105 = dma.done.wait [#allocation12], 128  }
0x167f   :  { %2106 = vsyncadd [#allocation12], 4294967168 }
0x1680   :  { %1555 = vsyncpa [#allocation5], 1 }
0x1681   :  { %1556 = vsyncpa [#allocation8], 1 }
0x1682   :  { %1557 = vsyncpa [#allocation6], 1 }
0x1683   :  { %1558 = vsyncpa [#allocation12], 1 }

</bundles_post_ra>
